<compile_context>
chip_gen: v7x
topology: tpu7x:2x2x1
jax: 0.10.0
libtpu: 0.0.40
codegen_flags: <defaults>
</compile_context>

<pallas_src>
import jax
import jax.numpy as jnp
from jax.experimental import pallas as pl
from jax.experimental.pallas import tpu as pltpu

INPUT_SIZE = 28 * 28   # 784
H1, H2, H3 = 512, 256, 128
NUM_CLASSES = 10       # linear4 exists in __init__ but is not used in forward


def _round_up(n, m):
    return ((n + m - 1) // m) * m


def _mlp_kernel(x_ref, w1_ref, b1_ref, w2_ref, b2_ref, w3_ref, b3_ref, o_ref):
    # Layer 1: relu(x @ W1 + b1)   (bf16 operands, f32 accumulation)
    x = x_ref[...].astype(jnp.bfloat16)
    h = jnp.dot(x, w1_ref[...], preferred_element_type=jnp.float32)
    h = jnp.maximum(h + b1_ref[...], 0.0)
    # Layer 2: relu(h @ W2 + b2)
    h = jnp.dot(h.astype(jnp.bfloat16), w2_ref[...],
                preferred_element_type=jnp.float32)
    h = jnp.maximum(h + b2_ref[...], 0.0)
    # Layer 3: relu(h @ W3 + b3)
    h = jnp.dot(h.astype(jnp.bfloat16), w3_ref[...],
                preferred_element_type=jnp.float32)
    h = jnp.maximum(h + b3_ref[...], 0.0)
    # Dropout(p=0.0) is the identity; no masking / scaling required.
    o_ref[...] = h.astype(o_ref.dtype)


def simple_fc_forward(x, params, *, block_b=128):
    """Fused 3-layer MLP (linear+relu x3, dropout p=0 == identity).

    Weights stay resident in VMEM (constant block index) while batch tiles of
    x / out stream through the pipeline.
    """
    w1, b1, w2, b2, w3, b3 = params
    B = x.shape[0]

    # Batch tile: multiple of 8 (sublane), capped at block_b.
    tb = min(block_b, _round_up(B, 8))
    Bp = _round_up(B, tb)
    if Bp != B:
        x = jnp.pad(x, ((0, Bp - B), (0, 0)))

    out = pl.pallas_call(
        _mlp_kernel,
        out_shape=jax.ShapeDtypeStruct((Bp, H3), jnp.float32),
        grid=(Bp // tb,),
        in_specs=[
            pl.BlockSpec((tb, INPUT_SIZE), lambda i: (i, 0)),   # x tile streams
            pl.BlockSpec((INPUT_SIZE, H1), lambda i: (0, 0)),   # weights resident
            pl.BlockSpec((1, H1), lambda i: (0, 0)),
            pl.BlockSpec((H1, H2), lambda i: (0, 0)),
            pl.BlockSpec((1, H2), lambda i: (0, 0)),
            pl.BlockSpec((H2, H3), lambda i: (0, 0)),
            pl.BlockSpec((1, H3), lambda i: (0, 0)),
        ],
        out_specs=pl.BlockSpec((tb, H3), lambda i: (i, 0)),
        compiler_params=pltpu.CompilerParams(
            dimension_semantics=("parallel",),   # batch tiles are independent
            vmem_limit_bytes=16 << 20,           # ~5 MB actual working set
        ),
    )(x, w1, b1, w2, b2, w3, b3)

    return out[:B]
    # TODO(synk): for serving-style repeated small-batch calls, keep weights
    # resident across pallas_call invocations (cross-call prefetch) instead of
    # re-DMAing them per call.


def init_params(key):
    """Deterministic init mimicking nn.Linear's U(-1/sqrt(fan_in), +1/sqrt(fan_in)).

    Weights are stored bf16 in (in_features, out_features) layout; biases f32 (1, out).
    """
    dims = [(INPUT_SIZE, H1), (H1, H2), (H2, H3)]
    params = []
    keys = jax.random.split(key, 2 * len(dims))
    for idx, (fan_in, fan_out) in enumerate(dims):
        bound = 1.0 / (fan_in ** 0.5)
        w = jax.random.uniform(keys[2 * idx], (fan_in, fan_out),
                               minval=-bound, maxval=bound, dtype=jnp.float32)
        b = jax.random.uniform(keys[2 * idx + 1], (1, fan_out),
                               minval=-bound, maxval=bound, dtype=jnp.float32)
        params += [w.astype(jnp.bfloat16), b]
    return tuple(params)


def reference_forward(x, params):
    """Pure-JAX reference using the same bf16 rounding of MXU inputs, f32 accumulation."""
    w1, b1, w2, b2, w3, b3 = params

    def layer(h, w, b):
        h16 = h.astype(jnp.bfloat16).astype(jnp.float32)
        w32 = w.astype(jnp.float32)
        return jnp.maximum(h16 @ w32 + b, 0.0)

    h = layer(x, w1, b1)
    h = layer(h, w2, b2)
    h = layer(h, w3, b3)
    return h  # dropout(p=0.0) == identity


if __name__ == "__main__":
    key = jax.random.PRNGKey(0)
    k_params, k_x1, k_x2 = jax.random.split(key, 3)
    params = init_params(k_params)

    # Small batch (single grid step).
    B1 = 16
    x1 = jax.random.normal(k_x1, (B1, INPUT_SIZE), dtype=jnp.float32)
    out1 = jax.block_until_ready(simple_fc_forward(x1, params))
    ref1 = reference_forward(x1, params)
    assert out1.shape == (B1, H3), out1.shape
    assert jnp.allclose(out1, ref1, atol=2e-3, rtol=2e-3), "mismatch vs reference (B=16)"

    # Larger, non-multiple batch to exercise tiling + padding path.
    B2 = 300
    x2 = jax.random.normal(k_x2, (B2, INPUT_SIZE), dtype=jnp.float32)
    out2 = jax.block_until_ready(simple_fc_forward(x2, params))
    ref2 = reference_forward(x2, params)
    assert out2.shape == (B2, H3), out2.shape
    assert jnp.allclose(out2, ref2, atol=2e-3, rtol=2e-3), "mismatch vs reference (B=300)"

    print("KERNEL_OK")
</pallas_src>

<mosaic_0001>
module attributes {stable_mosaic.version = 11 : i64} {
  func.func @_mlp_kernel(%arg0: i32, %arg1: memref<16x784xf32, #tpu.memory_space<vmem>>, %arg2: memref<784x512xbf16, #tpu.memory_space<vmem>>, %arg3: memref<1x512xf32, #tpu.memory_space<vmem>>, %arg4: memref<512x256xbf16, #tpu.memory_space<vmem>>, %arg5: memref<1x256xf32, #tpu.memory_space<vmem>>, %arg6: memref<256x128xbf16, #tpu.memory_space<vmem>>, %arg7: memref<1x128xf32, #tpu.memory_space<vmem>>, %arg8: memref<16x128xf32, #tpu.memory_space<vmem>>) attributes {dimension_semantics = [#tpu.dimension_semantics<parallel>], iteration_bounds = array<i64: 1>, scalar_prefetch = 0 : i64, scratch_operands = 0 : i64, tpu.core_type = #tpu.core_type<tc>, window_params = [{transform_indices = @transform_0, window_bounds = array<i64: 16, 784>}, {pipeline_mode = #tpu.pipeline_mode<synchronous>, transform_indices = @transform_1, window_bounds = array<i64: 784, 512>}, {pipeline_mode = #tpu.pipeline_mode<synchronous>, transform_indices = @transform_2, window_bounds = array<i64: 1, 512>}, {pipeline_mode = #tpu.pipeline_mode<synchronous>, transform_indices = @transform_3, window_bounds = array<i64: 512, 256>}, {pipeline_mode = #tpu.pipeline_mode<synchronous>, transform_indices = @transform_4, window_bounds = array<i64: 1, 256>}, {pipeline_mode = #tpu.pipeline_mode<synchronous>, transform_indices = @transform_5, window_bounds = array<i64: 256, 128>}, {pipeline_mode = #tpu.pipeline_mode<synchronous>, transform_indices = @transform_6, window_bounds = array<i64: 1, 128>}, {transform_indices = @transform_7, window_bounds = array<i64: 16, 128>}]} {
    %c0 = arith.constant 0 : index
    %c0_0 = arith.constant 0 : index
    %0 = vector.load %arg1[%c0, %c0_0] : memref<16x784xf32, #tpu.memory_space<vmem>>, vector<16x784xf32>
    %1 = arith.truncf %0 : vector<16x784xf32> to vector<16x784xbf16>
    %c0_1 = arith.constant 0 : index
    %c0_2 = arith.constant 0 : index
    %2 = vector.load %arg2[%c0_1, %c0_2] : memref<784x512xbf16, #tpu.memory_space<vmem>>, vector<784x512xbf16>
    %cst = arith.constant dense<0.000000e+00> : vector<16x512xf32>
    %3 = tpu.matmul %1, %2, %cst {dimension_numbers = #tpu.dot_dimension_numbers<[1], [0], [0], [1], [0, 0, 1, 1], [], []>} : vector<16x784xbf16>, vector<784x512xbf16>, vector<16x512xf32> -> vector<16x512xf32>
    %c0_3 = arith.constant 0 : index
    %c0_4 = arith.constant 0 : index
    %4 = vector.load %arg3[%c0_3, %c0_4] : memref<1x512xf32, #tpu.memory_space<vmem>>, vector<1x512xf32>
    %5 = vector.broadcast %4 : vector<1x512xf32> to vector<16x512xf32>
    %6 = arith.addf %3, %5 : vector<16x512xf32>
    %cst_5 = arith.constant 0.000000e+00 : f32
    %7 = vector.broadcast %cst_5 : f32 to vector<16x512xf32>
    %8 = arith.maximumf %6, %7 : vector<16x512xf32>
    %9 = arith.truncf %8 : vector<16x512xf32> to vector<16x512xbf16>
    %c0_6 = arith.constant 0 : index
    %c0_7 = arith.constant 0 : index
    %10 = vector.load %arg4[%c0_6, %c0_7] : memref<512x256xbf16, #tpu.memory_space<vmem>>, vector<512x256xbf16>
    %cst_8 = arith.constant dense<0.000000e+00> : vector<16x256xf32>
    %11 = tpu.matmul %9, %10, %cst_8 {dimension_numbers = #tpu.dot_dimension_numbers<[1], [0], [0], [1], [0, 0, 1, 1], [], []>} : vector<16x512xbf16>, vector<512x256xbf16>, vector<16x256xf32> -> vector<16x256xf32>
    %c0_9 = arith.constant 0 : index
    %c0_10 = arith.constant 0 : index
    %12 = vector.load %arg5[%c0_9, %c0_10] : memref<1x256xf32, #tpu.memory_space<vmem>>, vector<1x256xf32>
    %13 = vector.broadcast %12 : vector<1x256xf32> to vector<16x256xf32>
    %14 = arith.addf %11, %13 : vector<16x256xf32>
    %cst_11 = arith.constant 0.000000e+00 : f32
    %15 = vector.broadcast %cst_11 : f32 to vector<16x256xf32>
    %16 = arith.maximumf %14, %15 : vector<16x256xf32>
    %17 = arith.truncf %16 : vector<16x256xf32> to vector<16x256xbf16>
    %c0_12 = arith.constant 0 : index
    %c0_13 = arith.constant 0 : index
    %18 = vector.load %arg6[%c0_12, %c0_13] : memref<256x128xbf16, #tpu.memory_space<vmem>>, vector<256x128xbf16>
    %cst_14 = arith.constant dense<0.000000e+00> : vector<16x128xf32>
    %19 = tpu.matmul %17, %18, %cst_14 {dimension_numbers = #tpu.dot_dimension_numbers<[1], [0], [0], [1], [0, 0, 1, 1], [], []>} : vector<16x256xbf16>, vector<256x128xbf16>, vector<16x128xf32> -> vector<16x128xf32>
    %c0_15 = arith.constant 0 : index
    %c0_16 = arith.constant 0 : index
    %20 = vector.load %arg7[%c0_15, %c0_16] : memref<1x128xf32, #tpu.memory_space<vmem>>, vector<1x128xf32>
    %21 = vector.broadcast %20 : vector<1x128xf32> to vector<16x128xf32>
    %22 = arith.addf %19, %21 : vector<16x128xf32>
    %cst_17 = arith.constant 0.000000e+00 : f32
    %23 = vector.broadcast %cst_17 : f32 to vector<16x128xf32>
    %24 = arith.maximumf %22, %23 : vector<16x128xf32>
    %c0_18 = arith.constant 0 : index
    %c0_19 = arith.constant 0 : index
    %25 = vector.load %arg8[%c0_18, %c0_19] : memref<16x128xf32, #tpu.memory_space<vmem>>, vector<16x128xf32>
    tpu.vector_store %arg8[%c0_18, %c0_19], %24 {strides = array<i32>} : memref<16x128xf32, #tpu.memory_space<vmem>>, vector<16x128xf32>,
    return
  }
  func.func @transform_0(%arg0: i32) -> (i32, i32) {
    %c0_i32 = arith.constant 0 : i32
    %c0_i32_0 = arith.constant 0 : i32
    return %arg0, %c0_i32 : i32, i32
  }
  func.func @transform_1(%arg0: i32) -> (i32, i32) {
    %c0_i32 = arith.constant 0 : i32
    %c0_i32_0 = arith.constant 0 : i32
    %c0_i32_1 = arith.constant 0 : i32
    return %c0_i32, %c0_i32_0 : i32, i32
  }
  func.func @transform_2(%arg0: i32) -> (i32, i32) {
    %c0_i32 = arith.constant 0 : i32
    %c0_i32_0 = arith.constant 0 : i32
    %c0_i32_1 = arith.constant 0 : i32
    return %c0_i32, %c0_i32_0 : i32, i32
  }
  func.func @transform_3(%arg0: i32) -> (i32, i32) {
    %c0_i32 = arith.constant 0 : i32
    %c0_i32_0 = arith.constant 0 : i32
    %c0_i32_1 = arith.constant 0 : i32
    return %c0_i32, %c0_i32_0 : i32, i32
  }
  func.func @transform_4(%arg0: i32) -> (i32, i32) {
    %c0_i32 = arith.constant 0 : i32
    %c0_i32_0 = arith.constant 0 : i32
    %c0_i32_1 = arith.constant 0 : i32
    return %c0_i32, %c0_i32_0 : i32, i32
  }
  func.func @transform_5(%arg0: i32) -> (i32, i32) {
    %c0_i32 = arith.constant 0 : i32
    %c0_i32_0 = arith.constant 0 : i32
    %c0_i32_1 = arith.constant 0 : i32
    return %c0_i32, %c0_i32_0 : i32, i32
  }
  func.func @transform_6(%arg0: i32) -> (i32, i32) {
    %c0_i32 = arith.constant 0 : i32
    %c0_i32_0 = arith.constant 0 : i32
    %c0_i32_1 = arith.constant 0 : i32
    return %c0_i32, %c0_i32_0 : i32, i32
  }
  func.func @transform_7(%arg0: i32) -> (i32, i32) {
    %c0_i32 = arith.constant 0 : i32
    %c0_i32_0 = arith.constant 0 : i32
    return %arg0, %c0_i32 : i32, i32
  }
}

</mosaic_0001>

<bundles_post_ra>
// kernel: tpu_custom_call.1
= control target key start
LH: loop header
LB: loop body
LE: loop exit
PB: predicated region body
PF: predicated region fallthrough
CT: control target
= control target key end

     0   :  { %12 = vsyncpa [#allocation3], 0  ;;  %s3413_s0 = inlined_call_operand.hbm [shape: f32[16,784], index: 0, kind: input, shape index: {}]   ;;  %s3414_s1 = inlined_call_operand.hbm [shape: bf16[784,512], index: 1, kind: input, shape index: {}]   ;;  %s3415_s2 = inlined_call_operand.vmem [shape: f32[1,512], index: 2, kind: input, shape index: {}]   ;;  %s3416_s3 = inlined_call_operand.hbm [shape: bf16[512,256], index: 3, kind: input, shape index: {}]   ;;  %s3417_s4 = inlined_call_operand.vmem [shape: f32[1,256], index: 4, kind: input, shape index: {}]   ;;  %s3418_s5 = inlined_call_operand.hbm [shape: bf16[256,128], index: 5, kind: input, shape index: {}]   ;;  %s3419_s6 = inlined_call_operand.vmem [shape: f32[1,128], index: 6, kind: input, shape index: {}]   ;;  %s3420_s7 = inlined_call_operand.hbm [shape: f32[16,128], index: 7, kind: output, shape index: {}]  }
   0x1   :  { %13 = vsyncpa [#allocation6], 0 }
   0x2   :  { %14 = vsyncpa [#allocation9], 0 }
   0x3   :  { %15 = vsyncpa [#allocation4], 0  ;;  %s3228_s24 = smov [#allocation5]   ;;  %s3110_s28 = scalar_lea.hbm %s3414_s1, 25088 }
   0x4   :  { %s33_s25 = sshll.u32 %s3228_s24, 4  ;;  %p3111_p0 = scmp.ne.s32.totalorder %s3414_s1, %s3110_s28  ;;  %s34_s25 = int_to_ptr.vmem [resolvable:$true] %s33_s25 }
   0x5   :  { %p3114_p1 = scmp.lt.u32.totalorder %s3110_s28, %s3414_s1 }
   0x7   :  { %p3116_p2 = pnand %p3114_p1, %p3111_p0 }
   0x9   :  { %3119 = shalt.err (!%p3116_p2)
}
   0xa   :  { %s3120_s10 = scalar_lea.vmem %s34_s25, 25088  ;;  %p3125_p4 = scmp.lt.s32.totalorder %s34_s25, %s34_s25 }
   0xb   :  { %p3121_p3 = scmp.ne.s32.totalorder %s34_s25, %s3120_s10  ;;  %p3126_p5 = scmp.lt.s32.totalorder %s3120_s10, %s3120_s10 }
   0xd   :  { %p3127_p6 = por %p3126_p5, %p3125_p4 }
   0xf   :  { %p3128_p7 = pnand %p3127_p6, %p3121_p3 }
  0x11   :  { %3131 = shalt.err (!%p3128_p7)
}
  0x12   :  { %s3229_s11 = smov 256   ;;  %s3230_s12 = smov 16  }
  0x13   :  { %39 = dma.hbm_to_vmem [thread:$0]  %s3414_s1, 25088, %s34_s25, [#allocation6], %s3229_s11, %s3229_s11, %s3230_s12  }
  0x14   :  { %s3231_s15 = smov [#allocation2]   ;;  %s3132_s19 = scalar_lea.hbm %s3413_s0, 1792 }
  0x15   :  { %s21_s16 = sshll.u32 %s3231_s15, 4  ;;  %p3133_p8 = scmp.ne.s32.totalorder %s3413_s0, %s3132_s19  ;;  %s22_s16 = int_to_ptr.vmem [resolvable:$true] %s21_s16 }
  0x16   :  { %p3136_p9 = scmp.lt.u32.totalorder %s3132_s19, %s3413_s0 }
  0x18   :  { %p3138_p10 = pnand %p3136_p9, %p3133_p8 }
  0x1a   :  { %3141 = shalt.err (!%p3138_p10)
}
  0x1b   :  { %s3142_s24 = scalar_lea.vmem %s22_s16, 1792  ;;  %p3147_p12 = scmp.lt.s32.totalorder %s22_s16, %s22_s16 }
  0x1c   :  { %p3143_p11 = scmp.ne.s32.totalorder %s22_s16, %s3142_s24  ;;  %p3148_p13 = scmp.lt.s32.totalorder %s3142_s24, %s3142_s24 }
  0x1e   :  { %p3149_p0 = por %p3148_p13, %p3147_p12 }
  0x20   :  { %p3150_p1 = pnand %p3149_p0, %p3143_p11 }
  0x22   :  { %3153 = shalt.err (!%p3150_p1)
}
  0x23   :  { %s3232_s1 = smov 896   ;;  %s3233_s25 = smov 56  }
  0x24   :  { %27 = dma.hbm_to_vmem [thread:$0]  %s3413_s0, 1792, %s22_s16, [#allocation3], %s3232_s1, %s3232_s1, %s3233_s25  }
  0x25   :  { %s3234_s28 = smov [#allocation7]   ;;  %s3154_s9 = scalar_lea.hbm %s3416_s3, 8192 }
  0x26   :  { %s47_s29 = sshll.u32 %s3234_s28, 4  ;;  %p3155_p2 = scmp.ne.s32.totalorder %s3416_s3, %s3154_s9  ;;  %s48_s29 = int_to_ptr.vmem [resolvable:$true] %s47_s29 }
  0x27   :  { %p3158_p3 = scmp.lt.u32.totalorder %s3154_s9, %s3416_s3 }
  0x29   :  { %p3160_p4 = pnand %p3158_p3, %p3155_p2 }
  0x2b   :  { %3163 = shalt.err (!%p3160_p4)
}
  0x2c   :  { %s3164_s14 = scalar_lea.vmem %s48_s29, 8192  ;;  %p3169_p6 = scmp.lt.s32.totalorder %s48_s29, %s48_s29 }
  0x2d   :  { %p3165_p5 = scmp.ne.s32.totalorder %s48_s29, %s3164_s14  ;;  %p3170_p7 = scmp.lt.s32.totalorder %s3164_s14, %s3164_s14 }
  0x2f   :  { %p3171_p8 = por %p3170_p7, %p3169_p6 }
  0x31   :  { %p3172_p9 = pnand %p3171_p8, %p3165_p5 }
  0x33   :  { %3175 = shalt.err (!%p3172_p9)
}
  0x34   :  { %s3235_s0 = smov 128   ;;  %s3236_s15 = smov 8  }
  0x35   :  { %53 = dma.hbm_to_vmem [thread:$0]  %s3416_s3, 8192, %s48_s29, [#allocation6], %s3235_s0, %s3235_s0, %s3236_s15  }
  0x36   :  { %s3237_s18 = smov [#allocation8]   ;;  %s3176_s22 = scalar_lea.hbm %s3418_s5, 2048 }
  0x37   :  { %s61_s19 = sshll.u32 %s3237_s18, 4  ;;  %p3177_p10 = scmp.ne.s32.totalorder %s3418_s5, %s3176_s22  ;;  %s62_s19 = int_to_ptr.vmem [resolvable:$true] %s61_s19 }
  0x38   :  { %p3180_p11 = scmp.lt.u32.totalorder %s3176_s22, %s3418_s5 }
  0x3a   :  { %p3182_p12 = pnand %p3180_p11, %p3177_p10 }
  0x3c   :  { %3185 = shalt.err (!%p3182_p12)
}
  0x3d   :  { %s3186_s26 = scalar_lea.vmem %s62_s19, 2048  ;;  %p3191_p0 = scmp.lt.s32.totalorder %s62_s19, %s62_s19 }
  0x3e   :  { %p3187_p13 = scmp.ne.s32.totalorder %s62_s19, %s3186_s26  ;;  %p3192_p1 = scmp.lt.s32.totalorder %s3186_s26, %s3186_s26 }
  0x40   :  { %p3193_p2 = por %p3192_p1, %p3191_p0 }
  0x42   :  { %p3194_p3 = pnand %p3193_p2, %p3187_p13 }
  0x44   :  { %3197 = shalt.err (!%p3194_p3)
}
  0x45   :  { %s3238_s3 = smov 64   ;;  %s3239_s27 = smov 4  }
  0x46   :  { %67 = dma.hbm_to_vmem [thread:$0]  %s3418_s5, 2048, %s62_s19, [#allocation9], %s3238_s3, %s3238_s3, %s3239_s27  }
  0x47   :  { %3220 = dma.done.wait [#allocation3], 1792  }
  0x48   :  { %3221 = vsyncadd [#allocation3], 4294965504 }
  0x49   :  { %3222 = dma.done.wait [#allocation6], 33280  }
  0x4a   :  { %3223 = vsyncadd [#allocation6], 4294934016 }
  0x4b   :  { %3224 = dma.done.wait [#allocation9], 2048  }
  0x4c   :  { %3225 = vsyncadd [#allocation9], 4294965248  ;;  %v2704_v0 = vld [vmem:[#allocation5 + $0x4] ss:$16 sps:$4 sm:$0xff]   ;;  %v2708_v2 = vld [vmem:[#allocation5] ss:$16 sps:$4 sm:$0xff]  }
  0x4d   :  { %v2706_v1 = vld [vmem:[#allocation5 + $0x204] ss:$16 sps:$4 sm:$0xff]   ;;  %1306 = vmatprep.subr.bf16.mxu1 %v2704_v0  ;;  %v2709_v3 = vld [vmem:[#allocation5 + $0x200] ss:$16 sps:$4 sm:$0xff]   ;;  %v84_v46 = vld [vmem:[#allocation2 + $0x8] sm:$0xff]  ;;  %vm1302_vm0 = vcmask 130048  }
  0x4e   :  { %1349 = vmatprep.subr.bf16.mxu0 %v2706_v1  ;;  %v2710_v4 = vld [vmem:[#allocation5 + $0x24] ss:$16 sps:$4 sm:$0xff]   ;;  %1307 = vmatpush1.bf16.msra.mxu1 %v2708_v2  ;;  %v2714_v6 = vld [vmem:[#allocation5 + $0x20] ss:$16 sps:$4 sm:$0xff]   ;;  %v86_v51 = vld [vmem:[#allocation2 + $0x18] sm:$0xff]  ;;  %s3241_s10 = smov [#allocation10]  }
  0x4f   :  { %1350 = vmatpush1.bf16.msra.mxu0 %v2709_v3  ;;  %v2712_v5 = vld [vmem:[#allocation5 + $0x224] ss:$16 sps:$4 sm:$0xff]   ;;  %1308 = vmatprep.subr.bf16.mxu1 %v2710_v4  ;;  %v2715_v7 = vld [vmem:[#allocation5 + $0x220] ss:$16 sps:$4 sm:$0xff]   ;;  %s2335_s11 = sshll.u32 %s3241_s10, 4  ;;  %s2336_s11 = int_to_ptr.vmem [resolvable:$true] %s2335_s11 }
  0x50   :  { %1351 = vmatprep.subr.bf16.mxu0 %v2712_v5  ;;  %v2716_v8 = vld [vmem:[#allocation5 + $0x44] ss:$16 sps:$4 sm:$0xff]   ;;  %v2720_v10 = vld [vmem:[#allocation5 + $0x40] ss:$16 sps:$4 sm:$0xff]   ;;  %s3198_s12 = scalar_lea.vmem %s2336_s11, 256  ;;  %p3203_p5 = scmp.lt.s32.totalorder %s2336_s11, %s2336_s11 }
  0x51   :  { %v2718_v9 = vld [vmem:[#allocation5 + $0x244] ss:$16 sps:$4 sm:$0xff]   ;;  %v2721_v11 = vld [vmem:[#allocation5 + $0x240] ss:$16 sps:$4 sm:$0xff]   ;;  %p3199_p4 = scmp.ne.s32.totalorder %s2336_s11, %s3198_s12  ;;  %p3204_p6 = scmp.lt.s32.totalorder %s3198_s12, %s3198_s12 }
  0x52   :  { %1309 = vmatpush1.bf16.msra.mxu1 %v2714_v6  ;;  %v2722_v12 = vld [vmem:[#allocation5 + $0x64] ss:$16 sps:$4 sm:$0xff]   ;;  %v2726_v14 = vld [vmem:[#allocation5 + $0x60] ss:$16 sps:$4 sm:$0xff]  }
  0x53   :  { %1352 = vmatpush1.bf16.msra.mxu0 %v2715_v7  ;;  %1310 = vmatprep.subr.bf16.mxu1 %v2716_v8  ;;  %v2724_v13 = vld [vmem:[#allocation5 + $0x264] ss:$16 sps:$4 sm:$0xff]   ;;  %v2727_v15 = vld [vmem:[#allocation5 + $0x260] ss:$16 sps:$4 sm:$0xff]   ;;  %v90_v7 = vld [vmem:[#allocation2 + $0x38] sm:$0xff]  ;;  %p3205_p7 = por %p3204_p6, %p3203_p5 }
  0x54   :  { %1353 = vmatprep.subr.bf16.mxu0 %v2718_v9  ;;  %v2728_v16 = vld [vmem:[#allocation5 + $0x84] ss:$16 sps:$4 sm:$0xff]   ;;  %v2732_v18 = vld [vmem:[#allocation5 + $0x80] ss:$16 sps:$4 sm:$0xff]  }
  0x55   :  { %v2730_v17 = vld [vmem:[#allocation5 + $0x284] ss:$16 sps:$4 sm:$0xff]   ;;  %v2733_v19 = vld [vmem:[#allocation5 + $0x280] ss:$16 sps:$4 sm:$0xff]   ;;  %p3206_p8 = pnand %p3205_p7, %p3199_p4 }
  0x56   :  { %1311 = vmatpush1.bf16.msra.mxu1 %v2720_v10  ;;  %v2734_v20 = vld [vmem:[#allocation5 + $0xa4] ss:$16 sps:$4 sm:$0xff]   ;;  %v2738_v22 = vld [vmem:[#allocation5 + $0xa0] ss:$16 sps:$4 sm:$0xff]   ;;  %v92_v10 = vld [vmem:[#allocation2 + $0x48] sm:$0xff] }
  0x57   :  { %1354 = vmatpush1.bf16.msra.mxu0 %v2721_v11  ;;  %1312 = vmatprep.subr.bf16.mxu1 %v2722_v12  ;;  %v2736_v21 = vld [vmem:[#allocation5 + $0x2a4] ss:$16 sps:$4 sm:$0xff]   ;;  %v2739_v23 = vld [vmem:[#allocation5 + $0x2a0] ss:$16 sps:$4 sm:$0xff]   ;;  %v2805_v11 = vld [vmem:[#allocation5 + $0xc] ss:$16 sps:$4 sm:$0xff]  }
  0x58   :  { %1355 = vmatprep.subr.bf16.mxu0 %v2724_v13  ;;  %v2740_v24 = vld [vmem:[#allocation5 + $0xc4] ss:$16 sps:$4 sm:$0xff]   ;;  %v2744_v26 = vld [vmem:[#allocation5 + $0xc0] ss:$16 sps:$4 sm:$0xff]  }
  0x59   :  { %v2742_v25 = vld [vmem:[#allocation5 + $0x2c4] ss:$16 sps:$4 sm:$0xff]   ;;  %v2745_v27 = vld [vmem:[#allocation5 + $0x2c0] ss:$16 sps:$4 sm:$0xff]  }
  0x5a   :  { %1313 = vmatpush1.bf16.msra.mxu1 %v2726_v14  ;;  %v2746_v28 = vld [vmem:[#allocation5 + $0xe4] ss:$16 sps:$4 sm:$0xff]   ;;  %v2750_v30 = vld [vmem:[#allocation5 + $0xe0] ss:$16 sps:$4 sm:$0xff]   ;;  %v2803_v14 = vld [vmem:[#allocation5 + $0x8] ss:$16 sps:$4 sm:$0xff]  }
  0x5b   :  { %1356 = vmatpush1.bf16.msra.mxu0 %v2727_v15  ;;  %1314 = vmatprep.subr.bf16.mxu1 %v2728_v16  ;;  %v2748_v29 = vld [vmem:[#allocation5 + $0x2e4] ss:$16 sps:$4 sm:$0xff]   ;;  %v2751_v31 = vld [vmem:[#allocation5 + $0x2e0] ss:$16 sps:$4 sm:$0xff]  }
  0x5c   :  { %1357 = vmatprep.subr.bf16.mxu0 %v2730_v17  ;;  %v2752_v32 = vld [vmem:[#allocation5 + $0x104] ss:$16 sps:$4 sm:$0xff]   ;;  %v2756_v34 = vld [vmem:[#allocation5 + $0x100] ss:$16 sps:$4 sm:$0xff]   ;;  %v2811_v17 = vld [vmem:[#allocation5 + $0x2c] ss:$16 sps:$4 sm:$0xff]  }
  0x5d   :  { %v2754_v33 = vld [vmem:[#allocation5 + $0x304] ss:$16 sps:$4 sm:$0xff]   ;;  %v2757_v35 = vld [vmem:[#allocation5 + $0x300] ss:$16 sps:$4 sm:$0xff]  }
  0x5e   :  { %1315 = vmatpush1.bf16.msra.mxu1 %v2732_v18  ;;  %v2758_v36 = vld [vmem:[#allocation5 + $0x124] ss:$16 sps:$4 sm:$0xff]   ;;  %v2762_v38 = vld [vmem:[#allocation5 + $0x120] ss:$16 sps:$4 sm:$0xff]  }
  0x5f   :  { %1358 = vmatpush1.bf16.msra.mxu0 %v2733_v19  ;;  %1316 = vmatprep.subr.bf16.mxu1 %v2734_v20  ;;  %v2760_v37 = vld [vmem:[#allocation5 + $0x324] ss:$16 sps:$4 sm:$0xff]   ;;  %v2763_v39 = vld [vmem:[#allocation5 + $0x320] ss:$16 sps:$4 sm:$0xff]   ;;  %v2809_v19 = vld [vmem:[#allocation5 + $0x28] ss:$16 sps:$4 sm:$0xff]  }
  0x60   :  { %1359 = vmatprep.subr.bf16.mxu0 %v2736_v21  ;;  %v2764_v40 = vld [vmem:[#allocation5 + $0x144] ss:$16 sps:$4 sm:$0xff]   ;;  %v2768_v42 = vld [vmem:[#allocation5 + $0x140] ss:$16 sps:$4 sm:$0xff]   ;;  %v2817_v21 = vld [vmem:[#allocation5 + $0x4c] ss:$16 sps:$4 sm:$0xff]  }
  0x61   :  { %v2766_v41 = vld [vmem:[#allocation5 + $0x344] ss:$16 sps:$4 sm:$0xff]   ;;  %v2769_v43 = vld [vmem:[#allocation5 + $0x340] ss:$16 sps:$4 sm:$0xff]  }
  0x62   :  { %1317 = vmatpush1.bf16.msra.mxu1 %v2738_v22  ;;  %v2770_v44 = vld [vmem:[#allocation5 + $0x164] ss:$16 sps:$4 sm:$0xff]   ;;  %v2774_v47 = vld [vmem:[#allocation5 + $0x160] ss:$16 sps:$4 sm:$0xff]  }
  0x63   :  { %1360 = vmatpush1.bf16.msra.mxu0 %v2739_v23  ;;  %1318 = vmatprep.subr.bf16.mxu1 %v2740_v24  ;;  %v2772_v45 = vld [vmem:[#allocation5 + $0x364] ss:$16 sps:$4 sm:$0xff]   ;;  %v2775_v48 = vld [vmem:[#allocation5 + $0x360] ss:$16 sps:$4 sm:$0xff]   ;;  %v2815_v23 = vld [vmem:[#allocation5 + $0x48] ss:$16 sps:$4 sm:$0xff]  }
  0x64   :  { %1361 = vmatprep.subr.bf16.mxu0 %v2742_v25  ;;  %v91_v49 = vld [vmem:[#allocation2 + $0x40] sm:$0xff]  ;;  %v93_v52 = vld [vmem:[#allocation2 + $0x50] sm:$0xff]  ;;  %v2823_v25 = vld [vmem:[#allocation5 + $0x6c] ss:$16 sps:$4 sm:$0xff]  }
  0x65   :  { %v3333_v50 = vpack.c.bf16 %v91_v49, %v84_v46  ;;  %v2776_v53 = vld [vmem:[#allocation5 + $0x184] ss:$16 sps:$4 sm:$0xff]   ;;  %v3335_v55 = vpack.c.bf16 %v93_v52, %v86_v51  ;;  %v2780_v56 = vld [vmem:[#allocation5 + $0x180] ss:$16 sps:$4 sm:$0xff]   ;;  %v2845_v46 = vld [vmem:[#allocation5 + $0xe8] ss:$16 sps:$4 sm:$0xff]  }
  0x66   :  { %1319 = vmatpush1.bf16.msra.mxu1 %v2744_v26  ;;  %v2778_v54 = vld [vmem:[#allocation5 + $0x384] ss:$16 sps:$4 sm:$0xff]   ;;  %v2781_v57 = vld [vmem:[#allocation5 + $0x380] ss:$16 sps:$4 sm:$0xff]   ;;  %v2859_v52 = vld [vmem:[#allocation5 + $0x12c] ss:$16 sps:$4 sm:$0xff]  }
  0x67   :  { %1362 = vmatpush1.bf16.msra.mxu0 %v2745_v27  ;;  %1320 = vmatprep.subr.bf16.mxu1 %v2746_v28  ;;  %v2782_v58 = vld [vmem:[#allocation5 + $0x1a4] ss:$16 sps:$4 sm:$0xff]   ;;  %v2786_v60 = vld [vmem:[#allocation5 + $0x1a0] ss:$16 sps:$4 sm:$0xff]   ;;  %v2821_v27 = vld [vmem:[#allocation5 + $0x68] ss:$16 sps:$4 sm:$0xff]  }
  0x68   :  { %1363 = vmatprep.subr.bf16.mxu0 %v2748_v29  ;;  %1338 = vmatprep.mubr.bf16.mxu1 %v3333_v50  ;;  %v2784_v59 = vld [vmem:[#allocation5 + $0x3a4] ss:$16 sps:$4 sm:$0xff]   ;;  %v2787_v61 = vld [vmem:[#allocation5 + $0x3a0] ss:$16 sps:$4 sm:$0xff]   ;;  %v2829_v29 = vld [vmem:[#allocation5 + $0x8c] ss:$16 sps:$4 sm:$0xff]  }
  0x69   :  { %1381 = vmatprep.mubr.bf16.mxu0 %v3335_v55  ;;  %v2788_v62 = vld [vmem:[#allocation5 + $0x1c4] ss:$16 sps:$4 sm:$0xff]   ;;  %v2792_v0 = vld [vmem:[#allocation5 + $0x1c0] ss:$16 sps:$4 sm:$0xff]  }
  0x6a   :  { %1321 = vmatpush1.bf16.msra.mxu1 %v2750_v30  ;;  %v2790_v63 = vld [vmem:[#allocation5 + $0x3c4] ss:$16 sps:$4 sm:$0xff]   ;;  %v2793_v1 = vld [vmem:[#allocation5 + $0x3c0] ss:$16 sps:$4 sm:$0xff]  }
  0x6b   :  { %1364 = vmatpush1.bf16.msra.mxu0 %v2751_v31  ;;  %1322 = vmatprep.subr.bf16.mxu1 %v2752_v32  ;;  %v2794_v2 = vld [vmem:[#allocation5 + $0x1e4] ss:$16 sps:$4 sm:$0xff]   ;;  %v2798_v4 = vld [vmem:[#allocation5 + $0x1e0] ss:$16 sps:$4 sm:$0xff]   ;;  %v2827_v31 = vld [vmem:[#allocation5 + $0x88] ss:$16 sps:$4 sm:$0xff]  }
  0x6c   :  { %1365 = vmatprep.subr.bf16.mxu0 %v2754_v33  ;;  %v2796_v3 = vld [vmem:[#allocation5 + $0x3e4] ss:$16 sps:$4 sm:$0xff]   ;;  %v2799_v5 = vld [vmem:[#allocation5 + $0x3e0] ss:$16 sps:$4 sm:$0xff]   ;;  %v2835_v33 = vld [vmem:[#allocation5 + $0xac] ss:$16 sps:$4 sm:$0xff]  }
  0x6d   :  { %v83_v6 = vld [vmem:[#allocation2] sm:$0xff]  ;;  %v85_v9 = vld [vmem:[#allocation2 + $0x10] sm:$0xff] }
  0x6e   :  { %1323 = vmatpush1.bf16.msra.mxu1 %v2756_v34  ;;  %v2802_v8 = vld [vmem:[#allocation5 + $0x404] ss:$16 sps:$4 sm:$0xff]   ;;  %v3339_v12 = vpack.c.bf16 %v90_v7, %v83_v6  ;;  %v2800_v13 = vld [vmem:[#allocation5 + $0x400] ss:$16 sps:$4 sm:$0xff]   ;;  %v3341_v15 = vpack.c.bf16 %v92_v10, %v85_v9  ;;  %v2881_v7 = vld [vmem:[#allocation5 + $0x1a8] ss:$16 sps:$4 sm:$0xff]  }
  0x6f   :  { %1366 = vmatpush1.bf16.msra.mxu0 %v2757_v35  ;;  %1324 = vmatprep.subr.bf16.mxu1 %v2758_v36  ;;  %v2808_v16 = vld [vmem:[#allocation5 + $0x424] ss:$16 sps:$4 sm:$0xff]   ;;  %v2806_v18 = vld [vmem:[#allocation5 + $0x420] ss:$16 sps:$4 sm:$0xff]   ;;  %v2833_v35 = vld [vmem:[#allocation5 + $0xa8] ss:$16 sps:$4 sm:$0xff]  }
  0x70   :  { %1367 = vmatprep.subr.bf16.mxu0 %v2760_v37  ;;  %v2814_v20 = vld [vmem:[#allocation5 + $0x444] ss:$16 sps:$4 sm:$0xff]   ;;  %v2812_v22 = vld [vmem:[#allocation5 + $0x440] ss:$16 sps:$4 sm:$0xff]   ;;  %v2841_v37 = vld [vmem:[#allocation5 + $0xcc] ss:$16 sps:$4 sm:$0xff]  }
  0x71   :  { %v2820_v24 = vld [vmem:[#allocation5 + $0x464] ss:$16 sps:$4 sm:$0xff]   ;;  %v2818_v26 = vld [vmem:[#allocation5 + $0x460] ss:$16 sps:$4 sm:$0xff]   ;;  %v2889_v9 = vld [vmem:[#allocation5 + $0x1cc] ss:$16 sps:$4 sm:$0xff]  }
  0x72   :  { %1325 = vmatpush1.bf16.msra.mxu1 %v2762_v38  ;;  %v2826_v28 = vld [vmem:[#allocation5 + $0x484] ss:$16 sps:$4 sm:$0xff]   ;;  %v2824_v30 = vld [vmem:[#allocation5 + $0x480] ss:$16 sps:$4 sm:$0xff]  }
  0x73   :  { %1368 = vmatpush1.bf16.msra.mxu0 %v2763_v39  ;;  %1326 = vmatprep.subr.bf16.mxu1 %v2764_v40  ;;  %v2832_v32 = vld [vmem:[#allocation5 + $0x4a4] ss:$16 sps:$4 sm:$0xff]   ;;  %v2830_v34 = vld [vmem:[#allocation5 + $0x4a0] ss:$16 sps:$4 sm:$0xff]   ;;  %v2839_v39 = vld [vmem:[#allocation5 + $0xc8] ss:$16 sps:$4 sm:$0xff]  }
  0x74   :  { %1369 = vmatprep.subr.bf16.mxu0 %v2766_v41  ;;  %v2838_v36 = vld [vmem:[#allocation5 + $0x4c4] ss:$16 sps:$4 sm:$0xff]   ;;  %v2836_v38 = vld [vmem:[#allocation5 + $0x4c0] ss:$16 sps:$4 sm:$0xff]   ;;  %v88_v41 = vld [vmem:[#allocation2 + $0x28] sm:$0xff] }
  0x75   :  { %v2844_v40 = vld [vmem:[#allocation5 + $0x4e4] ss:$16 sps:$4 sm:$0xff]   ;;  %v2848_v49 = vld [vmem:[#allocation5 + $0x500] ss:$16 sps:$4 sm:$0xff]  }
  0x76   :  { %1327 = vmatpush1.bf16.msra.mxu1 %v2768_v42  ;;  %v95_v42 = vld [vmem:[#allocation2 + $0x60] sm:$0xff] }
  0x77   :  { %1370 = vmatpush1.bf16.msra.mxu0 %v2769_v43  ;;  %1328 = vmatprep.subr.bf16.mxu1 %v2770_v44  ;;  %v2847_v43 = vld [vmem:[#allocation5 + $0xec] ss:$16 sps:$4 sm:$0xff]   ;;  %v3346_v44 = vpack.c.bf16 %v95_v42, %v88_v41  ;;  %v2856_v51 = vld [vmem:[#allocation5 + $0x524] ss:$16 sps:$4 sm:$0xff]   ;;  %v2878_v6 = vld [vmem:[#allocation5 + $0x5a0] ss:$16 sps:$4 sm:$0xff]  }
  0x78   :  { %1371 = vmatprep.subr.bf16.mxu0 %v2772_v45  ;;  %v2842_v45 = vld [vmem:[#allocation5 + $0x4e0] ss:$16 sps:$4 sm:$0xff]   ;;  %v2922_v41 = vld [vmem:[#allocation5 + $0x2ec] ss:$16 sps:$4 sm:$0xff]  }
  0x79   :  { %v2884_v10 = vld [vmem:[#allocation5 + $0x5c0] ss:$16 sps:$4 sm:$0xff]  }
  0x7a   :  { %1329 = vmatpush1.bf16.msra.mxu1 %v2774_v47  ;;  %v2850_v47 = vld [vmem:[#allocation5 + $0x504] ss:$16 sps:$4 sm:$0xff]   ;;  %v2998_v42 = vld [vmem:[#allocation7] ss:$8 sps:$4 sm:$0xff]  }
  0x7b   :  { %1372 = vmatpush1.bf16.msra.mxu0 %v2775_v48  ;;  %1330 = vmatprep.subr.bf16.mxu1 %v2776_v53  ;;  %v2853_v48 = vld [vmem:[#allocation5 + $0x10c] ss:$16 sps:$4 sm:$0xff]   ;;  %v2854_v53 = vld [vmem:[#allocation5 + $0x520] ss:$16 sps:$4 sm:$0xff]  }
  0x7c   :  { %1373 = vmatprep.subr.bf16.mxu0 %v2778_v54  ;;  %v2857_v54 = vld [vmem:[#allocation5 + $0x128] ss:$16 sps:$4 sm:$0xff]  }
  0x7e   :  { %1331 = vmatpush1.bf16.msra.mxu1 %v2780_v56  ;;  %v2862_v56 = vld [vmem:[#allocation5 + $0x544] ss:$16 sps:$4 sm:$0xff]  }
  0x7f   :  { %1374 = vmatpush1.bf16.msra.mxu0 %v2781_v57  ;;  %1332 = vmatprep.subr.bf16.mxu1 %v2782_v58  ;;  %v2865_v57 = vld [vmem:[#allocation5 + $0x14c] ss:$16 sps:$4 sm:$0xff]   ;;  %v2860_v58 = vld [vmem:[#allocation5 + $0x540] ss:$16 sps:$4 sm:$0xff]  }
  0x80   :  { %1375 = vmatprep.subr.bf16.mxu0 %v2784_v59  ;;  %v2863_v59 = vld [vmem:[#allocation5 + $0x148] ss:$16 sps:$4 sm:$0xff]  }
  0x82   :  { %1333 = vmatpush1.bf16.msra.mxu1 %v2786_v60  ;;  %v2868_v60 = vld [vmem:[#allocation5 + $0x564] ss:$16 sps:$4 sm:$0xff]  }
  0x83   :  { %1376 = vmatpush1.bf16.msra.mxu0 %v2787_v61  ;;  %1334 = vmatprep.subr.bf16.mxu1 %v2788_v62  ;;  %v2871_v61 = vld [vmem:[#allocation5 + $0x16c] ss:$16 sps:$4 sm:$0xff]   ;;  %v2866_v62 = vld [vmem:[#allocation5 + $0x560] ss:$16 sps:$4 sm:$0xff]  }
  0x84   :  { %1377 = vmatprep.subr.bf16.mxu0 %v2790_v63  ;;  %v2869_v63 = vld [vmem:[#allocation5 + $0x168] ss:$16 sps:$4 sm:$0xff]  }
  0x86   :  { %1335 = vmatpush1.bf16.msra.mxu1 %v2792_v0  ;;  %v2874_v0 = vld [vmem:[#allocation5 + $0x584] ss:$16 sps:$4 sm:$0xff]  }
  0x87   :  { %1378 = vmatpush1.bf16.msra.mxu0 %v2793_v1  ;;  %1336 = vmatprep.subr.bf16.mxu1 %v2794_v2  ;;  %v2877_v1 = vld [vmem:[#allocation5 + $0x18c] ss:$16 sps:$4 sm:$0xff]   ;;  %v2872_v2 = vld [vmem:[#allocation5 + $0x580] ss:$16 sps:$4 sm:$0xff]  }
  0x88   :  { %1379 = vmatprep.subr.bf16.mxu0 %v2796_v3  ;;  %v2875_v3 = vld [vmem:[#allocation5 + $0x188] ss:$16 sps:$4 sm:$0xff]  }
  0x8a   :  { %1337 = vmatpush1.bf16.msra.mxu1 %v2798_v4  ;;  %v2880_v4 = vld [vmem:[#allocation5 + $0x5a4] ss:$16 sps:$4 sm:$0xff]  }
  0x8b   :  { %1380 = vmatpush1.bf16.msra.mxu0 %v2799_v5  ;;  %1478 = vmatprep.subr.bf16.mxu1 %v2805_v11  ;;  %v2883_v5 = vld [vmem:[#allocation5 + $0x1ac] ss:$16 sps:$4 sm:$0xff]   ;;  %v2887_v11 = vld [vmem:[#allocation5 + $0x1c8] ss:$16 sps:$4 sm:$0xff]  }
  0x8c   :  { %1392 = vmatprep.subr.bf16.mxu0 %v2802_v8  ;;  %v2886_v8 = vld [vmem:[#allocation5 + $0x5c4] ss:$16 sps:$4 sm:$0xff]  }
  0x8d   :  { %1339 = vmatmul.mubr.bf16.vlgmr.msra.gmra.mrb[0].mxu1 %v3339_v12 }
  0x8e   :  { %1382 = vmatmul.mubr.bf16.vlgmr.msra.gmra.mrb[0].mxu0 %v3341_v15  ;;  %1479 = vmatpush1.bf16.msra.mxu1 %v2803_v14  ;;  %v2895_v14 = vld [vmem:[#allocation5 + $0x1ec] ss:$16 sps:$4 sm:$0xff]  }
  0x8f   :  { %1393 = vmatpush1.bf16.msra.mxu0 %v2800_v13  ;;  %1480 = vmatprep.subr.bf16.mxu1 %v2811_v17  ;;  %v2892_v13 = vld [vmem:[#allocation5 + $0x5e4] ss:$16 sps:$4 sm:$0xff]   ;;  %v2893_v17 = vld [vmem:[#allocation5 + $0x1e8] ss:$16 sps:$4 sm:$0xff]  }
  0x90   :  { %1394 = vmatprep.subr.bf16.mxu0 %v2808_v16  ;;  %1510 = vmatprep.mubr.bf16.mxu1 %v3333_v50  ;;  %v2851_v50 = vld [vmem:[#allocation5 + $0x108] ss:$16 sps:$4 sm:$0xff]   ;;  %v2890_v16 = vld [vmem:[#allocation5 + $0x5e0] ss:$16 sps:$4 sm:$0xff]  }
  0x91   :  { %1424 = vmatprep.mubr.bf16.mxu0 %v3346_v44 }
  0x92   :  { %1481 = vmatpush1.bf16.msra.mxu1 %v2809_v19  ;;  %v94_v19 = vld [vmem:[#allocation2 + $0x58] sm:$0xff] }
  0x93   :  { %1395 = vmatpush1.bf16.msra.mxu0 %v2806_v18  ;;  %1482 = vmatprep.subr.bf16.mxu1 %v2817_v21  ;;  %v87_v18 = vld [vmem:[#allocation2 + $0x20] sm:$0xff] }
  0x94   :  { %1396 = vmatprep.subr.bf16.mxu0 %v2814_v20  ;;  %v2898_v20 = vld [vmem:[#allocation5 + $0x20c] ss:$16 sps:$4 sm:$0xff]   ;;  %v2904_v21 = vld [vmem:[#allocation5 + $0x604] ss:$16 sps:$4 sm:$0xff]  }
  0x96   :  { %1483 = vmatpush1.bf16.msra.mxu1 %v2815_v23  ;;  %v2896_v23 = vld [vmem:[#allocation5 + $0x208] ss:$16 sps:$4 sm:$0xff]  }
  0x97   :  { %1397 = vmatpush1.bf16.msra.mxu0 %v2812_v22  ;;  %1484 = vmatprep.subr.bf16.mxu1 %v2823_v25  ;;  %v3349_v22 = vpack.c.bf16 %v94_v19, %v87_v18  ;;  %v2901_v25 = vld [vmem:[#allocation5 + $0x22c] ss:$16 sps:$4 sm:$0xff]   ;;  %v3025_v19 = vld [vmem:[#allocation7 + $0x90] ss:$8 sps:$4 sm:$0xff]  }
  0x98   :  { %1398 = vmatprep.subr.bf16.mxu0 %v2820_v24  ;;  %v2902_v24 = vld [vmem:[#allocation5 + $0x600] ss:$16 sps:$4 sm:$0xff]   ;;  %v2949_v18 = vld [vmem:[#allocation5 + $0x40c] ss:$16 sps:$4 sm:$0xff]  }
  0x9a   :  { %1485 = vmatpush1.bf16.msra.mxu1 %v2821_v27  ;;  %v2907_v27 = vld [vmem:[#allocation5 + $0x24c] ss:$16 sps:$4 sm:$0xff]  }
  0x9b   :  { %1399 = vmatpush1.bf16.msra.mxu0 %v2818_v26  ;;  %1486 = vmatprep.subr.bf16.mxu1 %v2829_v29  ;;  %v2899_v26 = vld [vmem:[#allocation5 + $0x228] ss:$16 sps:$4 sm:$0xff]   ;;  %v2994_v29 = vld [vmem:[#allocation5 + $0x60c] ss:$16 sps:$4 sm:$0xff]  }
  0x9c   :  { %1400 = vmatprep.subr.bf16.mxu0 %v2826_v28  ;;  %v3240_v28 = vmov 0  }
  0x9e   :  { %1487 = vmatpush1.bf16.msra.mxu1 %v2827_v31  ;;  %v89_v31 = vld [vmem:[#allocation2 + $0x30] sm:$0xff] }
  0x9f   :  { %1401 = vmatpush1.bf16.msra.mxu0 %v2824_v30  ;;  %1488 = vmatprep.subr.bf16.mxu1 %v2835_v33  ;;  %v2905_v30 = vld [vmem:[#allocation5 + $0x248] ss:$16 sps:$4 sm:$0xff]   ;;  %v2910_v33 = vld [vmem:[#allocation5 + $0x26c] ss:$16 sps:$4 sm:$0xff]  }
  0xa0   :  { %1402 = vmatprep.subr.bf16.mxu0 %v2832_v32  ;;  %v96_v32 = vld [vmem:[#allocation2 + $0x68] sm:$0xff] }
  0xa2   :  { %1489 = vmatpush1.bf16.msra.mxu1 %v2833_v35  ;;  %v2992_v35 = vld [vmem:[#allocation5 + $0x608] ss:$16 sps:$4 sm:$0xff]  }
  0xa3   :  { %1403 = vmatpush1.bf16.msra.mxu0 %v2830_v34  ;;  %1490 = vmatprep.subr.bf16.mxu1 %v2841_v37  ;;  %v2908_v34 = vld [vmem:[#allocation5 + $0x268] ss:$16 sps:$4 sm:$0xff]  }
  0xa4   :  { %1404 = vmatprep.subr.bf16.mxu0 %v2838_v36  ;;  %v2913_v36 = vld [vmem:[#allocation5 + $0x28c] ss:$16 sps:$4 sm:$0xff]   ;;  %v2911_v37 = vld [vmem:[#allocation5 + $0x288] ss:$16 sps:$4 sm:$0xff]  }
  0xa6   :  { %1491 = vmatpush1.bf16.msra.mxu1 %v2839_v39  ;;  %v2919_v39 = vld [vmem:[#allocation5 + $0x2cc] ss:$16 sps:$4 sm:$0xff]  }
  0xa7   :  { %1405 = vmatpush1.bf16.msra.mxu0 %v2836_v38  ;;  %1492 = vmatprep.subr.bf16.mxu1 %v2847_v43  ;;  %v2916_v38 = vld [vmem:[#allocation5 + $0x2ac] ss:$16 sps:$4 sm:$0xff]  }
  0xa8   :  { %1406 = vmatprep.subr.bf16.mxu0 %v2844_v40  ;;  %v2917_v40 = vld [vmem:[#allocation5 + $0x2c8] ss:$16 sps:$4 sm:$0xff]   ;;  %v3000_v43 = vld [vmem:[#allocation7 + $0x4] ss:$8 sps:$4 sm:$0xff]  }
  0xaa   :  { %1493 = vmatpush1.bf16.msra.mxu1 %v2845_v46  ;;  %v2920_v46 = vld [vmem:[#allocation5 + $0x2e8] ss:$16 sps:$4 sm:$0xff]  }
  0xab   :  { %1407 = vmatpush1.bf16.msra.mxu0 %v2842_v45  ;;  %1494 = vmatprep.subr.bf16.mxu1 %v2853_v48  ;;  %v3003_v45 = vld [vmem:[#allocation7 + $0x14] ss:$8 sps:$4 sm:$0xff]   ;;  %v3001_v48 = vld [vmem:[#allocation7 + $0x10] ss:$8 sps:$4 sm:$0xff]  }
  0xac   :  { %1408 = vmatprep.subr.bf16.mxu0 %v2850_v47  ;;  %v2925_v47 = vld [vmem:[#allocation5 + $0x30c] ss:$16 sps:$4 sm:$0xff]  }
  0xae   :  { %1495 = vmatpush1.bf16.msra.mxu1 %v2851_v50  ;;  %v2923_v50 = vld [vmem:[#allocation5 + $0x308] ss:$16 sps:$4 sm:$0xff]  }
  0xaf   :  { %1409 = vmatpush1.bf16.msra.mxu0 %v2848_v49  ;;  %1496 = vmatprep.subr.bf16.mxu1 %v2859_v52  ;;  %v3006_v49 = vld [vmem:[#allocation7 + $0x24] ss:$8 sps:$4 sm:$0xff]   ;;  %v3004_v52 = vld [vmem:[#allocation7 + $0x20] ss:$8 sps:$4 sm:$0xff]  }
  0xb0   :  { %1410 = vmatprep.subr.bf16.mxu0 %v2856_v51  ;;  %v2928_v51 = vld [vmem:[#allocation5 + $0x32c] ss:$16 sps:$4 sm:$0xff]  }
  0xb2   :  { %1497 = vmatpush1.bf16.msra.mxu1 %v2857_v54  ;;  %v3009_v54 = vld [vmem:[#allocation7 + $0x34] ss:$8 sps:$4 sm:$0xff]  }
  0xb3   :  { %1411 = vmatpush1.bf16.msra.mxu0 %v2854_v53  ;;  %1498 = vmatprep.subr.bf16.mxu1 %v2865_v57  ;;  %v2926_v53 = vld [vmem:[#allocation5 + $0x328] ss:$16 sps:$4 sm:$0xff]  }
  0xb4   :  { %1412 = vmatprep.subr.bf16.mxu0 %v2862_v56  ;;  %v2931_v56 = vld [vmem:[#allocation5 + $0x34c] ss:$16 sps:$4 sm:$0xff]   ;;  %v3007_v57 = vld [vmem:[#allocation7 + $0x30] ss:$8 sps:$4 sm:$0xff]  }
  0xb6   :  { %1499 = vmatpush1.bf16.msra.mxu1 %v2863_v59  ;;  %v2929_v59 = vld [vmem:[#allocation5 + $0x348] ss:$16 sps:$4 sm:$0xff]  }
  0xb7   :  { %1413 = vmatpush1.bf16.msra.mxu0 %v2860_v58  ;;  %1500 = vmatprep.subr.bf16.mxu1 %v2871_v61  ;;  %v3012_v58 = vld [vmem:[#allocation7 + $0x44] ss:$8 sps:$4 sm:$0xff]   ;;  %v3010_v61 = vld [vmem:[#allocation7 + $0x40] ss:$8 sps:$4 sm:$0xff]  }
  0xb8   :  { %1414 = vmatprep.subr.bf16.mxu0 %v2868_v60  ;;  %v2934_v60 = vld [vmem:[#allocation5 + $0x36c] ss:$16 sps:$4 sm:$0xff]  }
  0xba   :  { %1501 = vmatpush1.bf16.msra.mxu1 %v2869_v63  ;;  %v2932_v63 = vld [vmem:[#allocation5 + $0x368] ss:$16 sps:$4 sm:$0xff]  }
  0xbb   :  { %1415 = vmatpush1.bf16.msra.mxu0 %v2866_v62  ;;  %1502 = vmatprep.subr.bf16.mxu1 %v2877_v1  ;;  %v3015_v62 = vld [vmem:[#allocation7 + $0x54] ss:$8 sps:$4 sm:$0xff]   ;;  %v3013_v1 = vld [vmem:[#allocation7 + $0x50] ss:$8 sps:$4 sm:$0xff]  }
  0xbc   :  { %1416 = vmatprep.subr.bf16.mxu0 %v2874_v0  ;;  %v2937_v0 = vld [vmem:[#allocation5 + $0x38c] ss:$16 sps:$4 sm:$0xff]  }
  0xbe   :  { %1503 = vmatpush1.bf16.msra.mxu1 %v2875_v3  ;;  %v2935_v3 = vld [vmem:[#allocation5 + $0x388] ss:$16 sps:$4 sm:$0xff]  }
  0xbf   :  { %1417 = vmatpush1.bf16.msra.mxu0 %v2872_v2  ;;  %1504 = vmatprep.subr.bf16.mxu1 %v2883_v5  ;;  %v3018_v2 = vld [vmem:[#allocation7 + $0x64] ss:$8 sps:$4 sm:$0xff]   ;;  %v3016_v5 = vld [vmem:[#allocation7 + $0x60] ss:$8 sps:$4 sm:$0xff]  }
  0xc0   :  { %1418 = vmatprep.subr.bf16.mxu0 %v2880_v4  ;;  %v2940_v4 = vld [vmem:[#allocation5 + $0x3ac] ss:$16 sps:$4 sm:$0xff]  }
  0xc2   :  { %1505 = vmatpush1.bf16.msra.mxu1 %v2881_v7  ;;  %v2938_v7 = vld [vmem:[#allocation5 + $0x3a8] ss:$16 sps:$4 sm:$0xff]  }
  0xc3   :  { %1419 = vmatpush1.bf16.msra.mxu0 %v2878_v6  ;;  %1506 = vmatprep.subr.bf16.mxu1 %v2889_v9  ;;  %v3021_v6 = vld [vmem:[#allocation7 + $0x74] ss:$8 sps:$4 sm:$0xff]   ;;  %v3019_v9 = vld [vmem:[#allocation7 + $0x70] ss:$8 sps:$4 sm:$0xff]  }
  0xc4   :  { %1420 = vmatprep.subr.bf16.mxu0 %v2886_v8  ;;  %v2943_v8 = vld [vmem:[#allocation5 + $0x3cc] ss:$16 sps:$4 sm:$0xff]  }
  0xc6   :  { %1507 = vmatpush1.bf16.msra.mxu1 %v2887_v11  ;;  %v2941_v11 = vld [vmem:[#allocation5 + $0x3c8] ss:$16 sps:$4 sm:$0xff]  }
  0xc7   :  { %1421 = vmatpush1.bf16.msra.mxu0 %v2884_v10  ;;  %1508 = vmatprep.subr.bf16.mxu1 %v2895_v14  ;;  %v3024_v10 = vld [vmem:[#allocation7 + $0x84] ss:$8 sps:$4 sm:$0xff]   ;;  %v3022_v14 = vld [vmem:[#allocation7 + $0x80] ss:$8 sps:$4 sm:$0xff]  }
  0xc8   :  { %1422 = vmatprep.subr.bf16.mxu0 %v2892_v13  ;;  %v2946_v13 = vld [vmem:[#allocation5 + $0x3ec] ss:$16 sps:$4 sm:$0xff]  }
  0xca   :  { %1509 = vmatpush1.bf16.msra.mxu1 %v2893_v17  ;;  %v2944_v17 = vld [vmem:[#allocation5 + $0x3e8] ss:$16 sps:$4 sm:$0xff]  }
  0xcb   :  { %1423 = vmatpush1.bf16.msra.mxu0 %v2890_v16  ;;  %1521 = vmatprep.subr.bf16.mxu1 %v2898_v20  ;;  %v3027_v16 = vld [vmem:[#allocation7 + $0x94] ss:$8 sps:$4 sm:$0xff]   ;;  %v3030_v20 = vld [vmem:[#allocation7 + $0xa4] ss:$8 sps:$4 sm:$0xff]  }
  0xcc   :  { %1435 = vmatprep.subr.bf16.mxu0 %v2904_v21  ;;  %v2947_v21 = vld [vmem:[#allocation5 + $0x408] ss:$16 sps:$4 sm:$0xff]  }
  0xcd   :  { %1511 = vmatmul.mubr.bf16.vlgmr.msra.gmra.mrb[4].mxu1 %v3339_v12  ;;  %v103_v12 = vpack.c.bf16 %v96_v32, %v89_v31  ;;  %v2958_v31 = vld [vmem:[#allocation5 + $0x46c] ss:$16 sps:$4 sm:$0xff]   ;;  %v3034_v32 = vld [vmem:[#allocation7 + $0xc0] ss:$8 sps:$4 sm:$0xff]  }
  0xce   :  { %1425 = vmatmul.mubr.bf16.vlgmr.msra.gmra.mrb[0].mxu0 %v3349_v22  ;;  %1522 = vmatpush1.bf16.msra.mxu1 %v2896_v23  ;;  %v2952_v23 = vld [vmem:[#allocation5 + $0x42c] ss:$16 sps:$4 sm:$0xff]  }
  0xcf   :  { %1436 = vmatpush1.bf16.msra.mxu0 %v2902_v24  ;;  %1523 = vmatprep.subr.bf16.mxu1 %v2901_v25  ;;  %v3028_v24 = vld [vmem:[#allocation7 + $0xa0] ss:$8 sps:$4 sm:$0xff]   ;;  %v3033_v25 = vld [vmem:[#allocation7 + $0xb4] ss:$8 sps:$4 sm:$0xff]  }
  0xd0   :  { %1467 = vmatprep.mubr.bf16.mxu0 %v3240_v28  ;;  %1553 = vmatprep.mubr.bf16.mxu1 %v3335_v55  ;;  %v2914_v55 = vld [vmem:[#allocation5 + $0x2a8] ss:$16 sps:$4 sm:$0xff]  }
  0xd1   :  { %1607 = vmatprep.subr.bf16.mxu0 %v2994_v29  ;;  %v3036_v29 = vld [vmem:[#allocation7 + $0xc4] ss:$8 sps:$4 sm:$0xff]  }
  0xd2   :  { %1524 = vmatpush1.bf16.msra.mxu1 %v2899_v26  ;;  %v2950_v26 = vld [vmem:[#allocation5 + $0x428] ss:$16 sps:$4 sm:$0xff]  }
  0xd3   :  { %1525 = vmatprep.subr.bf16.mxu1 %v2907_v27  ;;  %v2955_v27 = vld [vmem:[#allocation5 + $0x44c] ss:$16 sps:$4 sm:$0xff]  }
  0xd6   :  { %1526 = vmatpush1.bf16.msra.mxu1 %v2905_v30  ;;  %v2953_v30 = vld [vmem:[#allocation5 + $0x448] ss:$16 sps:$4 sm:$0xff]  }
  0xd7   :  { %1527 = vmatprep.subr.bf16.mxu1 %v2910_v33  ;;  %v3039_v33 = vld [vmem:[#allocation7 + $0xd4] ss:$8 sps:$4 sm:$0xff]  }
  0xda   :  { %2545 = vmatmul.mubr.msk.bf16.vlgmr.msra.gmra.mrb[0].mxu0 %vm1302_vm0, %v103_v12  ;;  %1528 = vmatpush1.bf16.msra.mxu1 %v2908_v34  ;;  %v2961_v34 = vld [vmem:[#allocation5 + $0x48c] ss:$16 sps:$4 sm:$0xff]  }
  0xdb   :  { %1608 = vmatpush1.bf16.msra.mxu0 %v2992_v35  ;;  %1529 = vmatprep.subr.bf16.mxu1 %v2913_v36  ;;  %v2959_v35 = vld [vmem:[#allocation5 + $0x488] ss:$16 sps:$4 sm:$0xff]  }
  0xdc   :  { %1639 = vmatprep.mubr.bf16.mxu0 %v3240_v28  ;;  %2058 = vmatprep.subr.bf16.mxu0 %v3000_v43  ;;  %v3031_v28 = vld [vmem:[#allocation7 + $0xb0] ss:$8 sps:$4 sm:$0xff]   ;;  %v3042_v43 = vld [vmem:[#allocation7 + $0xe4] ss:$8 sps:$4 sm:$0xff]  }
  0xdd   :  { %v2962_v36 = vld [vmem:[#allocation5 + $0x4a8] ss:$16 sps:$4 sm:$0xff]  }
  0xde   :  { %1530 = vmatpush1.bf16.msra.mxu1 %v2911_v37  ;;  %v2967_v37 = vld [vmem:[#allocation5 + $0x4cc] ss:$16 sps:$4 sm:$0xff]  }
  0xdf   :  { %1531 = vmatprep.subr.bf16.mxu1 %v2916_v38  ;;  %v2965_v38 = vld [vmem:[#allocation5 + $0x4c8] ss:$16 sps:$4 sm:$0xff]  }
  0xe2   :  { %2546 = vmatmul.mubr.msk.bf16.vlgmr.msra.gmra.mrb[4].mxu0 %vm1302_vm0, %v103_v12  ;;  %1532 = vmatpush1.bf16.msra.mxu1 %v2914_v55  ;;  %v2964_v12 = vld [vmem:[#allocation5 + $0x4ac] ss:$16 sps:$4 sm:$0xff]  }
  0xe3   :  { %1533 = vmatprep.subr.bf16.mxu1 %v2919_v39  ;;  %2059 = vmatpush1.bf16.msra.mxu0 %v2998_v42  ;;  %v2970_v55 = vld [vmem:[#allocation5 + $0x4ec] ss:$16 sps:$4 sm:$0xff]   ;;  %v2968_v39 = vld [vmem:[#allocation5 + $0x4e8] ss:$16 sps:$4 sm:$0xff]  }
  0xe4   :  { %2060 = vmatprep.subr.bf16.mxu0 %v3003_v45  ;;  %v2976_v42 = vld [vmem:[#allocation5 + $0x52c] ss:$16 sps:$4 sm:$0xff]   ;;  %v2974_v45 = vld [vmem:[#allocation5 + $0x528] ss:$16 sps:$4 sm:$0xff]  }
  0xe6   :  { %1534 = vmatpush1.bf16.msra.mxu1 %v2917_v40  ;;  %v2973_v40 = vld [vmem:[#allocation5 + $0x50c] ss:$16 sps:$4 sm:$0xff]  }
  0xe7   :  { %1535 = vmatprep.subr.bf16.mxu1 %v2922_v41  ;;  %2061 = vmatpush1.bf16.msra.mxu0 %v3001_v48  ;;  %v2971_v41 = vld [vmem:[#allocation5 + $0x508] ss:$16 sps:$4 sm:$0xff]   ;;  %v3045_v48 = vld [vmem:[#allocation7 + $0xf4] ss:$8 sps:$4 sm:$0xff]  }
  0xe8   :  { %2062 = vmatprep.subr.bf16.mxu0 %v3006_v49  ;;  %v2977_v49 = vld [vmem:[#allocation5 + $0x548] ss:$16 sps:$4 sm:$0xff]  }
  0xea   :  { %1536 = vmatpush1.bf16.msra.mxu1 %v2920_v46  ;;  %v3040_v46 = vld [vmem:[#allocation7 + $0xe0] ss:$8 sps:$4 sm:$0xff]  }
  0xeb   :  { %1537 = vmatprep.subr.bf16.mxu1 %v2925_v47  ;;  %2063 = vmatpush1.bf16.msra.mxu0 %v3004_v52  ;;  %v2979_v47 = vld [vmem:[#allocation5 + $0x54c] ss:$16 sps:$4 sm:$0xff]   ;;  %v2980_v52 = vld [vmem:[#allocation5 + $0x568] ss:$16 sps:$4 sm:$0xff]  }
  0xec   :  { %2064 = vmatprep.subr.bf16.mxu0 %v3009_v54  ;;  %v3048_v54 = vld [vmem:[#allocation7 + $0x104] ss:$8 sps:$4 sm:$0xff]  }
  0xee   :  { %1538 = vmatpush1.bf16.msra.mxu1 %v2923_v50  ;;  %v3043_v50 = vld [vmem:[#allocation7 + $0xf0] ss:$8 sps:$4 sm:$0xff]  }
  0xef   :  { %1539 = vmatprep.subr.bf16.mxu1 %v2928_v51  ;;  %2065 = vmatpush1.bf16.msra.mxu0 %v3007_v57  ;;  %v2982_v51 = vld [vmem:[#allocation5 + $0x56c] ss:$16 sps:$4 sm:$0xff]  }
  0xf0   :  { %2066 = vmatprep.subr.bf16.mxu0 %v3012_v58  ;;  %v2988_v57 = vld [vmem:[#allocation5 + $0x5ac] ss:$16 sps:$4 sm:$0xff]   ;;  %v2986_v58 = vld [vmem:[#allocation5 + $0x5a8] ss:$16 sps:$4 sm:$0xff]  }
  0xf2   :  { %1540 = vmatpush1.bf16.msra.mxu1 %v2926_v53  ;;  %v2985_v53 = vld [vmem:[#allocation5 + $0x58c] ss:$16 sps:$4 sm:$0xff]  }
  0xf3   :  { %1541 = vmatprep.subr.bf16.mxu1 %v2931_v56  ;;  %2067 = vmatpush1.bf16.msra.mxu0 %v3010_v61  ;;  %v2983_v56 = vld [vmem:[#allocation5 + $0x588] ss:$16 sps:$4 sm:$0xff]   ;;  %v2997_v61 = vld [vmem:[#allocation5 + $0x5ec] ss:$16 sps:$4 sm:$0xff]  }
  0xf4   :  { %2068 = vmatprep.subr.bf16.mxu0 %v3015_v62  ;;  %v2995_v62 = vld [vmem:[#allocation5 + $0x5e8] ss:$16 sps:$4 sm:$0xff]  }
  0xf6   :  { %1542 = vmatpush1.bf16.msra.mxu1 %v2929_v59  ;;  %v2991_v59 = vld [vmem:[#allocation5 + $0x5cc] ss:$16 sps:$4 sm:$0xff]  }
  0xf7   :  { %1543 = vmatprep.subr.bf16.mxu1 %v2934_v60  ;;  %2069 = vmatpush1.bf16.msra.mxu0 %v3013_v1  ;;  %v2989_v60 = vld [vmem:[#allocation5 + $0x5c8] ss:$16 sps:$4 sm:$0xff]  }
  0xf8   :  { %2070 = vmatprep.subr.bf16.mxu0 %v3018_v2 }
  0xfa   :  { %1544 = vmatpush1.bf16.msra.mxu1 %v2932_v63 }
  0xfb   :  { %1545 = vmatprep.subr.bf16.mxu1 %v2937_v0  ;;  %2071 = vmatpush1.bf16.msra.mxu0 %v3016_v5 }
  0xfc   :  { %2072 = vmatprep.subr.bf16.mxu0 %v3021_v6  ;;  %v3363_v6 = vld [vmem:[%s3415_s2] sm:$0xf] }
  0xfe   :  { %1546 = vmatpush1.bf16.msra.mxu1 %v2935_v3  ;;  %v302_v3 = vlaneseq }
  0xff   :  { %1547 = vmatprep.subr.bf16.mxu1 %v2940_v4  ;;  %2073 = vmatpush1.bf16.msra.mxu0 %v3019_v9 }
 0x100   :  { %2074 = vmatprep.subr.bf16.mxu0 %v3024_v10  ;;  %v3357_v4 = vshrl.u32 %v302_v3, 7  ;;  %v3082_v3 = vld [vmem:[#allocation7 + $0x1c0] ss:$8 sps:$4 sm:$0xff]  }
 0x102   :  { %1548 = vmatpush1.bf16.msra.mxu1 %v2938_v7  ;;  %v304_v5 = vsub.s32 0, %v3357_v4  ;;  %v308_v7 = vsub.s32 1, %v3357_v4 }
 0x103   :  { %1549 = vmatprep.subr.bf16.mxu1 %v2943_v8  ;;  %2075 = vmatpush1.bf16.msra.mxu0 %v3022_v14 }
 0x104   :  { %2076 = vmatprep.subr.bf16.mxu0 %v3027_v16  ;;  %v309_v8 = vrot.slane %v3363_v6, %v308_v7 }
 0x106   :  { %1550 = vmatpush1.bf16.msra.mxu1 %v2941_v11 }
 0x107   :  { %1551 = vmatprep.subr.bf16.mxu1 %v2946_v13  ;;  %2077 = vmatpush1.bf16.msra.mxu0 %v3025_v19  ;;  %v3096_v19 = vld [vmem:[#allocation8 + $0x48] sm:$0xff]  }
 0x108   :  { %2078 = vmatprep.subr.bf16.mxu0 %v3030_v20 }
 0x10a   :  { %1552 = vmatpush1.bf16.msra.mxu1 %v2944_v17  ;;  %v3094_v17 = vld [vmem:[#allocation8 + $0x40] sm:$0xff]  }
 0x10b   :  { %1564 = vmatprep.subr.bf16.mxu1 %v2949_v18  ;;  %2079 = vmatpush1.bf16.msra.mxu0 %v3028_v24  ;;  %v3095_v18 = vld [vmem:[#allocation8] sm:$0xff]  }
 0x10c   :  { %2080 = vmatprep.subr.bf16.mxu0 %v3033_v25 }
 0x10d   :  { %1554 = vmatmul.mubr.bf16.vlgmr.msra.gmra.mrb[4].mxu1 %v3341_v15  ;;  %v2956_v15 = vld [vmem:[#allocation5 + $0x468] ss:$16 sps:$4 sm:$0xff]  }
 0x10e   :  { %1565 = vmatpush1.bf16.msra.mxu1 %v2947_v21  ;;  %1596 = vmatprep.mubr.bf16.mxu1 %v3346_v44  ;;  %v3037_v44 = vld [vmem:[#allocation7 + $0xd0] ss:$8 sps:$4 sm:$0xff]  }
 0x10f   :  { %1566 = vmatprep.subr.bf16.mxu1 %v2952_v23  ;;  %2081 = vmatpush1.bf16.msra.mxu0 %v3031_v28 }
 0x110   :  { %2082 = vmatprep.subr.bf16.mxu0 %v3036_v29 }
 0x112   :  { %1567 = vmatpush1.bf16.msra.mxu1 %v2950_v26 }
 0x113   :  { %1568 = vmatprep.subr.bf16.mxu1 %v2955_v27  ;;  %2083 = vmatpush1.bf16.msra.mxu0 %v3034_v32  ;;  %v3097_v27 = vld [vmem:[#allocation8 + $0x8] sm:$0xff]  }
 0x114   :  { %2084 = vmatprep.subr.bf16.mxu0 %v3039_v33 }
 0x116   :  { %1569 = vmatpush1.bf16.msra.mxu1 %v2953_v30  ;;  %v3098_v30 = vld [vmem:[#allocation8 + $0x50] sm:$0xff]  }
 0x117   :  { %1570 = vmatprep.subr.bf16.mxu1 %v2958_v31  ;;  %2085 = vmatpush1.bf16.msra.mxu0 %v3037_v44 }
 0x118   :  { %2086 = vmatprep.subr.bf16.mxu0 %v3042_v43  ;;  %v3052_v43 = vld [vmem:[#allocation7 + $0x120] ss:$8 sps:$4 sm:$0xff]  }
 0x11a   :  { %1571 = vmatpush1.bf16.msra.mxu1 %v2956_v15 }
 0x11b   :  { %1572 = vmatprep.subr.bf16.mxu1 %v2961_v34  ;;  %2087 = vmatpush1.bf16.msra.mxu0 %v3040_v46  ;;  %v3046_v34 = vld [vmem:[#allocation7 + $0x100] ss:$8 sps:$4 sm:$0xff]   ;;  %v3057_v46 = vld [vmem:[#allocation7 + $0x134] ss:$8 sps:$4 sm:$0xff]  }
 0x11c   :  { %2088 = vmatprep.subr.bf16.mxu0 %v3045_v48  ;;  %v3055_v48 = vld [vmem:[#allocation7 + $0x130] ss:$8 sps:$4 sm:$0xff]  }
 0x11e   :  { %1573 = vmatpush1.bf16.msra.mxu1 %v2959_v35  ;;  %v3099_v35 = vld [vmem:[#allocation8 + $0x10] sm:$0xff]  }
 0x11f   :  { %1574 = vmatprep.subr.bf16.mxu1 %v2964_v12  ;;  %2089 = vmatpush1.bf16.msra.mxu0 %v3043_v50  ;;  %v3051_v12 = vld [vmem:[#allocation7 + $0x114] ss:$8 sps:$4 sm:$0xff]   ;;  %v3058_v50 = vld [vmem:[#allocation7 + $0x140] ss:$8 sps:$4 sm:$0xff]  }
 0x120   :  { %2101 = vmatprep.subr.bf16.mxu0 %v3048_v54  ;;  %v3064_v54 = vld [vmem:[#allocation7 + $0x160] ss:$8 sps:$4 sm:$0xff]  }
 0x122   :  { %1575 = vmatpush1.bf16.msra.mxu1 %v2962_v36 }
 0x123   :  { %1576 = vmatprep.subr.bf16.mxu1 %v2967_v37  ;;  %v3100_v37 = vld [vmem:[#allocation8 + $0x58] sm:$0xff]  }
 0x126   :  { %1577 = vmatpush1.bf16.msra.mxu1 %v2965_v38 }
 0x127   :  { %1578 = vmatprep.subr.bf16.mxu1 %v2970_v55 }
 0x12a   :  { %1579 = vmatpush1.bf16.msra.mxu1 %v2968_v39  ;;  %v3049_v39 = vld [vmem:[#allocation7 + $0x110] ss:$8 sps:$4 sm:$0xff]  }
 0x12b   :  { %1580 = vmatprep.subr.bf16.mxu1 %v2973_v40  ;;  %v3101_v40 = vld [vmem:[#allocation8 + $0x18] sm:$0xff]  }
 0x12e   :  { %1581 = vmatpush1.bf16.msra.mxu1 %v2971_v41  ;;  %v3054_v41 = vld [vmem:[#allocation7 + $0x124] ss:$8 sps:$4 sm:$0xff]  }
 0x12f   :  { %1582 = vmatprep.subr.bf16.mxu1 %v2976_v42  ;;  %v3102_v42 = vld [vmem:[#allocation8 + $0x60] sm:$0xff]  }
 0x132   :  { %1583 = vmatpush1.bf16.msra.mxu1 %v2974_v45  ;;  %v3103_v45 = vld [vmem:[#allocation8 + $0x20] sm:$0xff]  }
 0x133   :  { %1584 = vmatprep.subr.bf16.mxu1 %v2979_v47  ;;  %v3104_v47 = vld [vmem:[#allocation8 + $0x68] sm:$0xff]  }
 0x136   :  { %1585 = vmatpush1.bf16.msra.mxu1 %v2977_v49  ;;  %v3060_v49 = vld [vmem:[#allocation7 + $0x144] ss:$8 sps:$4 sm:$0xff]  }
 0x137   :  { %1586 = vmatprep.subr.bf16.mxu1 %v2982_v51  ;;  %v3063_v51 = vld [vmem:[#allocation7 + $0x154] ss:$8 sps:$4 sm:$0xff]  }
 0x13a   :  { %1587 = vmatpush1.bf16.msra.mxu1 %v2980_v52  ;;  %v3061_v52 = vld [vmem:[#allocation7 + $0x150] ss:$8 sps:$4 sm:$0xff]  }
 0x13b   :  { %1588 = vmatprep.subr.bf16.mxu1 %v2985_v53  ;;  %v3066_v53 = vld [vmem:[#allocation7 + $0x164] ss:$8 sps:$4 sm:$0xff]  }
 0x13e   :  { %1589 = vmatpush1.bf16.msra.mxu1 %v2983_v56  ;;  %v3069_v56 = vld [vmem:[#allocation7 + $0x174] ss:$8 sps:$4 sm:$0xff]  }
 0x13f   :  { %1590 = vmatprep.subr.bf16.mxu1 %v2988_v57  ;;  %v3067_v57 = vld [vmem:[#allocation7 + $0x170] ss:$8 sps:$4 sm:$0xff]  }
 0x142   :  { %1591 = vmatpush1.bf16.msra.mxu1 %v2986_v58  ;;  %v3072_v58 = vld [vmem:[#allocation7 + $0x184] ss:$8 sps:$4 sm:$0xff]  }
 0x143   :  { %1592 = vmatprep.subr.bf16.mxu1 %v2991_v59  ;;  %v3070_v59 = vld [vmem:[#allocation7 + $0x180] ss:$8 sps:$4 sm:$0xff]  }
 0x146   :  { %1593 = vmatpush1.bf16.msra.mxu1 %v2989_v60  ;;  %v3075_v60 = vld [vmem:[#allocation7 + $0x194] ss:$8 sps:$4 sm:$0xff]  }
 0x147   :  { %1594 = vmatprep.subr.bf16.mxu1 %v2997_v61  ;;  %v3073_v61 = vld [vmem:[#allocation7 + $0x190] ss:$8 sps:$4 sm:$0xff]  }
 0x14a   :  { %1595 = vmatpush1.bf16.msra.mxu1 %v2995_v62  ;;  %v3078_v62 = vld [vmem:[#allocation7 + $0x1a4] ss:$8 sps:$4 sm:$0xff]  }
 0x14b   :  { %2628 = vmatprep.subr.bf16.mxu1 %v3094_v17 }
 0x14d   :  { %1597 = vmatmul.mubr.bf16.vlgmr.msra.gmra.mrb[4].mxu1 %v3349_v22  ;;  %v305_v22 = vrot.slane %v3363_v6, %v304_v5 }
 0x14e   :  { %2629 = vmatpush3.bf16.msra.mxu1 %v3095_v18 }
 0x14f   :  { %2630 = vmatprep.subr.bf16.mxu1 %v3096_v19 }
 0x152   :  { %2631 = vmatpush3.bf16.msra.mxu1 %v3097_v27 }
 0x153   :  { %2632 = vmatprep.subr.bf16.mxu1 %v3098_v30 }
 0x156   :  { %2633 = vmatpush3.bf16.msra.mxu1 %v3099_v35 }
 0x157   :  { %2634 = vmatprep.subr.bf16.mxu1 %v3100_v37  ;;  %v3107_v37 = vld [vmem:[#allocation8 + $0x30] sm:$0xff]  }
 0x15a   :  { %2635 = vmatpush3.bf16.msra.mxu1 %v3101_v40 }
 0x15b   :  { %2636 = vmatprep.subr.bf16.mxu1 %v3102_v42 }
 0x15e   :  { %2637 = vmatpush3.bf16.msra.mxu1 %v3103_v45 }
 0x15f   :  { %2638 = vmatprep.subr.bf16.mxu1 %v3104_v47 }
 0x160   :  { %v1340_v63 = vpop.f32.mrb[0].mxu1 }
 0x161   :  { %v1342_v0 = vpop.f32.mrb[1].mxu1  ;;  %v1341_v9 = vadd.f32 %v1340_v63, %v305_v22  ;;  %v3076_v63 = vld [vmem:[#allocation7 + $0x1a0] ss:$8 sps:$4 sm:$0xff]  }
 0x162   :  { %v1344_v1 = vpop.f32.mrb[2].mxu1  ;;  %v1343_v10 = vadd.f32 %v1342_v0, %v309_v8  ;;  %v3081_v0 = vld [vmem:[#allocation7 + $0x1b4] ss:$8 sps:$4 sm:$0xff]  }
 0x163   :  { %v1346_v2 = vpop.f32.mrb[3].mxu1  ;;  %v1345_v13 = vadd.f32 %v1344_v1, %v305_v22  ;;  %v3079_v1 = vld [vmem:[#allocation7 + $0x1b0] ss:$8 sps:$4 sm:$0xff]   ;;  %v3087_v22 = vld [vmem:[#allocation7 + $0x1d4] ss:$8 sps:$4 sm:$0xff]  }
 0x164   :  { %v1347_v20 = vadd.f32 %v1346_v2, %v309_v8  ;;  %v3084_v2 = vld [vmem:[#allocation7 + $0x1c4] ss:$8 sps:$4 sm:$0xff]   ;;  %v3085_v8 = vld [vmem:[#allocation7 + $0x1d0] ss:$8 sps:$4 sm:$0xff]  }
 0x1ad   :  { %v1469_v11 = vpop.f32.mrb[0].mxu0 }
 0x1ae   :  { %v2651_v14 = vadd.f32 %v1469_v11, %v1341_v9  ;;  %v1471_v16 = vpop.f32.mrb[1].mxu0  ;;  %v3090_v9 = vld [vmem:[#allocation7 + $0x1e4] ss:$8 sps:$4 sm:$0xff]   ;;  %v3093_v11 = vld [vmem:[#allocation7 + $0x1f4] ss:$8 sps:$4 sm:$0xff]  }
 0x1af   :  { %v2653_v21 = vadd.f32 %v1471_v16, %v1343_v10  ;;  %v1473_v23 = vpop.f32.mrb[2].mxu0  ;;  %v3088_v10 = vld [vmem:[#allocation7 + $0x1e0] ss:$8 sps:$4 sm:$0xff]   ;;  %v316_v16 = vsub.s32 3, %v3357_v4 }
 0x1b0   :  { %v2655_v24 = vadd.f32 %v1473_v23, %v1345_v13  ;;  %v1475_v25 = vpop.f32.mrb[3].mxu0  ;;  %v1650_v28 = vmax.f32 %v2651_v14, 0.0  ;;  %v3091_v13 = vld [vmem:[#allocation7 + $0x1f0] ss:$8 sps:$4 sm:$0xff]   ;;  %v312_v14 = vsub.s32 2, %v3357_v4 }
 0x1b1   :  { %v2657_v26 = vadd.f32 %v1475_v25, %v1347_v20  ;;  %v1651_v31 = vmax.f32 %v2653_v21, 0.0  ;;  %v317_v18 = vrot.slane %v3363_v6, %v316_v16  ;;  %v2611_v4 = vld [vmem:[%s3419_s6] ss:$0 sm:$0xff] }
 0x1b2   :  { %v1654_v29 = vmax.f32 %v2655_v24, 0.0  ;;  %v313_v17 = vrot.slane %v3363_v6, %v312_v14 }
 0x1b3   :  { %v1655_v32 = vmax.f32 %v2657_v26, 0.0 }
 0x1b4   :  { %v1658_v33 = vpack.c.bf16 %v1654_v29, %v1650_v28 }
 0x1b5   :  { %v1659_v15 = vpack.c.bf16 %v1655_v32, %v1651_v31  ;;  %v3372_v44 = vpop.f32.mrb[4].mxu0 }
 0x1b6   :  { %v3374_v36 = vpop.f32.mrb[5].mxu0 }
 0x1b7   :  { %2090 = vmatprep.mubr.bf16.mxu0 %v1659_v15  ;;  %v3376_v38 = vpop.f32.mrb[6].mxu0 }
 0x1b8   :  { %2091 = vmatmul.mubr.bf16.vlgmr.msra.gmra.mrb[8].mxu0 %v1658_v33  ;;  %v3378_v55 = vpop.f32.mrb[7].mxu0 }
 0x1b9   :  { %2102 = vmatpush1.bf16.msra.mxu0 %v3046_v34 }
 0x1ba   :  { %2103 = vmatprep.subr.bf16.mxu0 %v3051_v12  ;;  %v3105_v12 = vld [vmem:[#allocation8 + $0x28] sm:$0xff]  }
 0x1bb   :  { %2639 = vmatpush3.bf16.msra.mxu1 %v3105_v12 }
 0x1bd   :  { %2104 = vmatpush1.bf16.msra.mxu0 %v3049_v39  ;;  %v3109_v39 = vld [vmem:[#allocation8 + $0x38] sm:$0xff]  }
 0x1be   :  { %2105 = vmatprep.subr.bf16.mxu0 %v3054_v41 }
 0x1c1   :  { %2106 = vmatpush1.bf16.msra.mxu0 %v3052_v43 }
 0x1c2   :  { %2107 = vmatprep.subr.bf16.mxu0 %v3057_v46 }
 0x1c5   :  { %2108 = vmatpush1.bf16.msra.mxu0 %v3055_v48 }
 0x1c6   :  { %2109 = vmatprep.subr.bf16.mxu0 %v3060_v49 }
 0x1c9   :  { %2110 = vmatpush1.bf16.msra.mxu0 %v3058_v50 }
 0x1ca   :  { %2111 = vmatprep.subr.bf16.mxu0 %v3063_v51 }
 0x1cd   :  { %2112 = vmatpush1.bf16.msra.mxu0 %v3061_v52 }
 0x1ce   :  { %2113 = vmatprep.subr.bf16.mxu0 %v3066_v53 }
 0x1d1   :  { %2114 = vmatpush1.bf16.msra.mxu0 %v3064_v54 }
 0x1d2   :  { %2115 = vmatprep.subr.bf16.mxu0 %v3069_v56 }
 0x1d5   :  { %2116 = vmatpush1.bf16.msra.mxu0 %v3067_v57 }
 0x1d6   :  { %2117 = vmatprep.subr.bf16.mxu0 %v3072_v58 }
 0x1d9   :  { %2118 = vmatpush1.bf16.msra.mxu0 %v3070_v59 }
 0x1da   :  { %2119 = vmatprep.subr.bf16.mxu0 %v3075_v60 }
 0x1dd   :  { %2120 = vmatpush1.bf16.msra.mxu0 %v3073_v61 }
 0x1de   :  { %2121 = vmatprep.subr.bf16.mxu0 %v3078_v62 }
 0x1e1   :  { %2122 = vmatpush1.bf16.msra.mxu0 %v3076_v63 }
 0x1e2   :  { %2123 = vmatprep.subr.bf16.mxu0 %v3081_v0 }
 0x1e5   :  { %2124 = vmatpush1.bf16.msra.mxu0 %v3079_v1 }
 0x1e6   :  { %2125 = vmatprep.subr.bf16.mxu0 %v3084_v2 }
 0x1e9   :  { %2126 = vmatpush1.bf16.msra.mxu0 %v3082_v3 }
 0x1ea   :  { %2127 = vmatprep.subr.bf16.mxu0 %v3087_v22 }
 0x1ed   :  { %2128 = vmatpush1.bf16.msra.mxu0 %v3085_v8 }
 0x1ee   :  { %2129 = vmatprep.subr.bf16.mxu0 %v3090_v9 }
 0x1f1   :  { %2130 = vmatpush1.bf16.msra.mxu0 %v3088_v10 }
 0x1f2   :  { %2131 = vmatprep.subr.bf16.mxu0 %v3093_v11 }
 0x1f5   :  { %2132 = vmatpush1.bf16.msra.mxu0 %v3091_v13 }
 0x220   :  { %v1598_v19 = vpop.f32.mrb[4].mxu1 }
 0x221   :  { %v2658_v20 = vadd.f32 %v1598_v19, %v313_v17  ;;  %v1600_v21 = vpop.f32.mrb[5].mxu1 }
 0x222   :  { %v2660_v23 = vadd.f32 %v1600_v21, %v317_v18  ;;  %v1602_v24 = vpop.f32.mrb[6].mxu1 }
 0x223   :  { %v2659_v25 = vadd.f32 %v2658_v20, %v3372_v44  ;;  %v2662_v26 = vadd.f32 %v1602_v24, %v313_v17  ;;  %v1604_v27 = vpop.f32.mrb[7].mxu1  ;;  %v3106_v44 = vld [vmem:[#allocation8 + $0x70] sm:$0xff]  }
 0x224   :  { %v2661_v28 = vadd.f32 %v2660_v23, %v3374_v36  ;;  %v2664_v29 = vadd.f32 %v1604_v27, %v317_v18  ;;  %2640 = vmatprep.subr.bf16.mxu1 %v3106_v44  ;;  %v3108_v36 = vld [vmem:[#allocation8 + $0x78] sm:$0xff]  }
 0x225   :  { %v2663_v30 = vadd.f32 %v2662_v26, %v3376_v38  ;;  %v1652_v32 = vmax.f32 %v2659_v25, 0.0  ;;  %2641 = vmatpush3.bf16.msra.mxu1 %v3107_v37  ;;  %v1726_v38 = vld [vmem:[%s3417_s4] sm:$0x3] }
 0x226   :  { %v2665_v31 = vadd.f32 %v2664_v29, %v3378_v55  ;;  %v1653_v15 = vmax.f32 %v2661_v28, 0.0  ;;  %2642 = vmatprep.subr.bf16.mxu1 %v3108_v36  ;;  %v1731_v55 = vrot.slane %v1726_v38, %v304_v5  ;;  %v1735_v40 = vrot.slane %v1726_v38, %v308_v7 }
 0x227   :  { %v1656_v33 = vmax.f32 %v2663_v30, 0.0 }
 0x228   :  { %v1657_v6 = vmax.f32 %v2665_v31, 0.0 }
 0x229   :  { %v1660_v34 = vpack.c.bf16 %v1656_v33, %v1652_v32  ;;  %2643 = vmatpush3.bf16.msra.mxu1 %v3109_v39 }
 0x22a   :  { %v1661_v35 = vpack.c.bf16 %v1657_v6, %v1653_v15 }
 0x22c   :  { %2133 = vmatprep.mubr.bf16.mxu0 %v1661_v35 }
 0x22d   :  { %2134 = vmatmul.mubr.bf16.vlgmr.msra.gmra.mrb[8].mxu0 %v1660_v34 }
 0x300   :  { %v2135_v41 = vpop.f32.mrb[8].mxu0 }
 0x301   :  { %v2666_v42 = vadd.f32 %v2135_v41, %v1731_v55  ;;  %v2137_v43 = vpop.f32.mrb[9].mxu0 }
 0x302   :  { %v2667_v45 = vadd.f32 %v2137_v43, %v1735_v40  ;;  %v2139_v46 = vpop.f32.mrb[10].mxu0 }
 0x303   :  { %v2668_v47 = vadd.f32 %v2139_v46, %v1731_v55  ;;  %v2141_v48 = vpop.f32.mrb[11].mxu0  ;;  %v2144_v50 = vmax.f32 %v2666_v42, 0.0 }
 0x304   :  { %v2669_v49 = vadd.f32 %v2141_v48, %v1735_v40  ;;  %v2145_v52 = vmax.f32 %v2667_v45, 0.0 }
 0x305   :  { %v2146_v51 = vmax.f32 %v2668_v47, 0.0 }
 0x306   :  { %v2147_v53 = vmax.f32 %v2669_v49, 0.0 }
 0x307   :  { %v2148_v54 = vpack.c.bf16 %v2146_v51, %v2144_v50 }
 0x308   :  { %v2149_v56 = vpack.c.bf16 %v2147_v53, %v2145_v52 }
 0x30a   :  { %2317 = vmatprep.mubr.bf16.mxu1 %v2149_v56 }
 0x30b   :  { %2318 = vmatmul.mubr.bf16.vlgmr.msra.gmra.mrb[8].mxu1 %v2148_v54 }
 0x3de   :  { %v2644_v5 = vpop.f32.mrb[8].mxu1 }
 0x3df   :  { %v2645_v7 = vpop.f32.mrb[9].mxu1 }
 0x3e0   :  { %v2646_v57 = vadd.f32 %v2645_v7, %v2644_v5  ;;  %v2647_v58 = vpop.f32.mrb[10].mxu1 }
 0x3e1   :  { %v2648_v59 = vpop.f32.mrb[11].mxu1 }
 0x3e2   :  { %v2320_v60 = vadd.f32 %v2646_v57, %v2611_v4  ;;  %v2649_v61 = vadd.f32 %v2648_v59, %v2647_v58 }
 0x3e4   :  { %v2326_v62 = vmax.f32 %v2320_v60, 0.0  ;;  %v2323_v63 = vadd.f32 %v2649_v61, %v2611_v4 }
 0x3e6   :  { %2328 = vst [vmem:[#allocation10] sm:$0xff] %v2326_v62  ;;  %v2327_v0 = vmax.f32 %v2323_v63, 0.0 }
 0x3e8   :  { %2329 = vst [vmem:[#allocation10 + $0x8] sm:$0xff] %v2327_v0 }
 0x3e9   :  { %3209 = shalt.err (!%p3206_p8)
}
 0x3ea   :  { %s3210_s14 = scalar_lea.hbm %s3420_s7, 256 }
 0x3eb   :  { %p3211_p9 = scmp.ne.s32.totalorder %s3420_s7, %s3210_s14  ;;  %p3214_p10 = scmp.lt.u32.totalorder %s3210_s14, %s3420_s7 }
 0x3ed   :  { %p3216_p11 = pnand %p3214_p10, %p3211_p9 }
 0x3ef   :  { %3219 = shalt.err (!%p3216_p11)
}
 0x3f0   :  { %2341 = dma.vmem_to_hbm [thread:$0]  %s2336_s11, 256, %s3420_s7, [#allocation4], %s3235_s0, %s3235_s0, %s3236_s15  }
 0x3f1   :  { %3226 = dma.done.wait [#allocation4], 256  }
 0x3f2   :  { %3227 = vsyncadd [#allocation4], 4294967040 }
 0x3f3   :  { %2345 = vsyncpa [#allocation3], 1 }
 0x3f4   :  { %2346 = vsyncpa [#allocation6], 1 }
 0x3f5   :  { %2347 = vsyncpa [#allocation9], 1 }
 0x3f6   :  { %2348 = vsyncpa [#allocation4], 1 }

</bundles_post_ra>
